<compile_context>
chip_gen: v7x
topology: tpu7x:2x2x1
jax: 0.10.0
libtpu: 0.0.40
codegen_flags: <defaults>
</compile_context>

<pallas_src>
import jax
import jax.numpy as jnp
from jax.experimental import pallas as pl
from jax.experimental.pallas import tpu as pltpu


_VPU_CHUNK = 512          # lane-axis chunk for the VPU accumulate loop
# Crossover between the VPU multiply-add path and the MXU matmul path.
# (Review: ~256 on v5e's 128x128 MXU, ~512-1024 on v6e/v7x's 256x256 MXU; a
#  single compromise keeps tiny-channel configs like this module on the VPU.)
_VPU_MXU_CROSSOVER = 512


def _round_up(x, m):
    return ((x + m - 1) // m) * m


def _vpu_chunk_size(tr):
    """Largest lane chunk <= 512 that divides the row tile (tr is a 128-multiple)."""
    if tr <= _VPU_CHUNK:
        return tr
    for c in (512, 384, 256, 128):
        if tr % c == 0:
            return c
    return tr


def _pointwise_vpu_kernel(x_ref, w_ref, b_ref, o_ref):
    # x_ref: (C_in, TR) — spatial rows on lanes, channels on sublanes
    # w_ref: (C_out, C_in); b_ref: (C_out, 1); o_ref: (C_out, TR) lane-dense
    c_out, c_in = w_ref.shape
    tr = o_ref.shape[-1]
    chunk = _vpu_chunk_size(tr)
    n_chunks = tr // chunk

    # Hoisted out of the chunk loop (JAX does not CSE broadcasts in loops):
    # weight-column lane splats and the bias broadcast / accumulator init.
    w = w_ref[...].astype(jnp.float32)
    w_cols = [w[:, ci:ci + 1] for ci in range(c_in)]                 # (C_out, 1)
    bias_chunk = jnp.broadcast_to(b_ref[...].astype(jnp.float32), (c_out, chunk))

    if n_chunks == 1:
        # Whole tile fits one chunk (demo path): accumulator lives in vregs.
        acc = bias_chunk
        xf = x_ref[...].astype(jnp.float32)
        for ci in range(c_in):                                        # static unroll
            acc = acc + w_cols[ci] * xf[ci:ci + 1, :]
        o_ref[...] = acc.astype(o_ref.dtype)
    else:
        def chunk_body(c, carry):
            start = pl.multiple_of(c * chunk, 128)
            acc = bias_chunk
            for ci in range(c_in):                                    # static unroll
                xrow = x_ref[pl.ds(ci, 1), pl.ds(start, chunk)].astype(jnp.float32)
                acc = acc + w_cols[ci] * xrow
            o_ref[:, pl.ds(start, chunk)] = acc.astype(o_ref.dtype)
            return carry

        jax.lax.fori_loop(0, n_chunks, chunk_body, 0, unroll=True)


def _pointwise_mxu_kernel(x_ref, w_ref, b_ref, o_ref, acc_ref):
    # x_ref: (TK, TR); w_ref: (C_out, TK); b_ref: (C_out, 1)
    # o_ref: (C_out, TR); acc_ref: (C_out, TR) f32 scratch, resident across K.
    k = pl.program_id(2)

    @pl.when(k == 0)
    def _():
        acc_ref[...] = jnp.broadcast_to(b_ref[...].astype(jnp.float32),
                                        acc_ref.shape)

    x = x_ref[...]
    # NOTE: w is cast down to x.dtype so the MXU runs at the input's native
    # precision (e.g. bf16 x bf16 -> f32 accumulate); the slight precision loss
    # vs keeping w in f32 is accepted here.
    acc_ref[...] += jnp.dot(w_ref[...].astype(x.dtype), x,
                            preferred_element_type=jnp.float32)

    @pl.when(k == pl.num_programs(2) - 1)
    def _():
        o_ref[...] = acc_ref[...].astype(o_ref.dtype)


def _pick_row_tile(hw_pad, per_tr_bytes, budget_bytes):
    """Largest 128-multiple divisor of hw_pad whose full (double-buffered)
    per-row-tile footprint fits budget_bytes."""
    divisors = [t for t in range(128, hw_pad + 1, 128) if hw_pad % t == 0]
    fitting = [t for t in divisors if t * per_tr_bytes <= budget_bytes]
    return max(fitting) if fitting else 128


def _pick_k_tile(c_in, cap=512):
    """Contraction tile: whole C_in if small, else largest divisor <= cap that
    keeps sublanes aligned (multiple of 8)."""
    if c_in <= cap:
        return c_in
    for tk in range(cap, 7, -8):
        if c_in % tk == 0:
            return tk
    return c_in


def linear_1x1(x_nchw, weight, bias):
    """Equivalent of nn.Conv2d(c_in, c_out, kernel_size=1, bias=True) on NCHW.

    weight: (C_out, C_in, 1, 1), bias: (C_out,)
    """
    N, C_in, H, W = x_nchw.shape
    C_out = weight.shape[0]
    HW = H * W
    dtype = x_nchw.dtype
    itemsize = jnp.dtype(dtype).itemsize

    # Pad H*W to a 128 multiple so the last dim stays lane-dense.
    HW_pad = _round_up(HW, 128)

    x3 = x_nchw.reshape(N, C_in, HW)            # trailing-dim collapse only
    if HW_pad != HW:
        x3 = jnp.pad(x3, ((0, 0), (0, 0), (0, HW_pad - HW)))

    w = weight.reshape(C_out, C_in)
    b = bias.reshape(C_out, 1)

    # ---- generation-aware VMEM budget ------------------------------------
    try:
        vmem_cap = int(pltpu.get_tpu_info().vmem_capacity_bytes)
    except Exception:                           # query unavailable: assume 128 MiB
        vmem_cap = 128 << 20
    budget = min(vmem_cap // 4, 48 << 20)       # ~16 MiB on v7x, ~32 MiB v5e/v6e

    # (8,128)-tile sublane padding; sub-32-bit dtypes pack more rows per tile.
    rows_per_tile = 8 * max(1, 4 // itemsize)
    c_in_pad = _round_up(C_in, rows_per_tile)
    c_out_pad = _round_up(C_out, rows_per_tile)
    c_out_pad_f32 = _round_up(C_out, 8)

    use_mxu = (C_in * C_out) > _VPU_MXU_CROSSOVER

    if use_mxu:
        tk = _pick_k_tile(C_in)
        tk_pad = _round_up(tk, rows_per_tile)
        # 2-deep x + out blocks, plus the single f32 accumulator scratch.
        per_tr_bytes = 2 * (tk_pad + c_out_pad) * itemsize + c_out_pad_f32 * 4
    else:
        tk = C_in
        per_tr_bytes = 2 * (c_in_pad + c_out_pad) * itemsize

    tr = _pick_row_tile(HW_pad, per_tr_bytes, budget)

    # Guarantee >= 2 megacore-shardable grid steps for v7x's two TensorCores.
    if N * (HW_pad // tr) < 2 and tr % 256 == 0:
        tr //= 2

    n_row_steps = HW_pad // tr
    n_steps = N * n_row_steps

    # Scoped VMEM limit sized from the chosen tiles (+ the small w/b blocks).
    small_blocks = 2 * (c_out_pad * _round_up(max(C_in, tk), 128)
                        + c_out_pad * 128) * itemsize
    footprint = per_tr_bytes * tr + small_blocks
    vmem_limit = int(min(vmem_cap // 2, max(footprint + (2 << 20), 16 << 20)))

    if use_mxu:
        grid = (N, n_row_steps, C_in // tk)
        in_specs = [
            pl.BlockSpec((None, tk, tr), lambda n, r, k: (n, k, r)),
            pl.BlockSpec((C_out, tk), lambda n, r, k: (0, k)),
            pl.BlockSpec((C_out, 1), lambda n, r, k: (0, 0)),
        ]
        out_specs = pl.BlockSpec((None, C_out, tr), lambda n, r, k: (n, 0, r))
        scratch_shapes = [pltpu.VMEM((C_out, tr), jnp.float32)]
        dims = ("parallel", "parallel", "arbitrary")
        kernel = _pointwise_mxu_kernel
    else:
        x_spec = pl.BlockSpec((None, C_in, tr), lambda n, r: (n, 0, r))
        if n_steps >= 8 and c_in_pad * tr * itemsize <= (256 << 10):
            # Many short steps on tiny tiles: deepen pipelining to hide DMA latency.
            x_spec = pl.BlockSpec((None, C_in, tr), lambda n, r: (n, 0, r),
                                  pipeline_mode=pl.Buffered(3))
        grid = (N, n_row_steps)
        in_specs = [
            x_spec,
            pl.BlockSpec((C_out, C_in), lambda n, r: (0, 0)),
            pl.BlockSpec((C_out, 1), lambda n, r: (0, 0)),
        ]
        out_specs = pl.BlockSpec((None, C_out, tr), lambda n, r: (n, 0, r))
        scratch_shapes = []
        dims = ("parallel", "parallel")
        kernel = _pointwise_vpu_kernel

    out3 = pl.pallas_call(
        kernel,
        out_shape=jax.ShapeDtypeStruct((N, C_out, HW_pad), dtype),
        grid_spec=pltpu.PrefetchScalarGridSpec(
            num_scalar_prefetch=0,
            grid=grid,
            in_specs=in_specs,
            out_specs=out_specs,
            scratch_shapes=scratch_shapes,
        ),
        compiler_params=pltpu.CompilerParams(
            dimension_semantics=dims,
            vmem_limit_bytes=vmem_limit,
        ),
    )(x3, w, b)

    if HW_pad != HW:
        out3 = out3[:, :, :HW]
    # Trailing-dim split only — output is already in NCHW channel order.
    return out3.reshape(N, C_out, H, W)


if __name__ == "__main__":
    key = jax.random.PRNGKey(0)
    k_x, k_w, k_b = jax.random.split(key, 3)

    # Module config: linear(c_in=4, c_out=8); input NCHW = (2, 4, 16, 16)
    N, C_in, H, W = 2, 4, 16, 16
    C_out = 8

    x = jax.random.normal(k_x, (N, C_in, H, W), dtype=jnp.float32)
    # Conv2d weight shape (C_out, C_in, 1, 1), bias (C_out,)
    weight = jax.random.normal(k_w, (C_out, C_in, 1, 1), dtype=jnp.float32) * 0.1
    bias = jax.random.normal(k_b, (C_out,), dtype=jnp.float32) * 0.1

    out = jax.block_until_ready(linear_1x1(x, weight, bias))

    # Reference check in plain JAX (same math as Conv2d 1x1 + bias)
    ref = jnp.einsum("nchw,oc->nohw", x, weight.reshape(C_out, C_in)) \
        + bias[None, :, None, None]
    assert out.shape == (N, C_out, H, W)
    assert jnp.allclose(out, ref, atol=1e-5, rtol=1e-5)

    print("KERNEL_OK")
</pallas_src>

<mosaic_0001>
module attributes {stable_mosaic.version = 11 : i64} {
  func.func @_pointwise_vpu_kernel(%arg0: i32, %arg1: i32, %arg2: memref<1x4x256xf32, #tpu.memory_space<vmem>>, %arg3: memref<8x4xf32, #tpu.memory_space<vmem>>, %arg4: memref<8x1xf32, #tpu.memory_space<vmem>>, %arg5: memref<1x8x256xf32, #tpu.memory_space<vmem>>) attributes {dimension_semantics = [#tpu.dimension_semantics<parallel>, #tpu.dimension_semantics<parallel>], iteration_bounds = array<i64: 2, 1>, scalar_prefetch = 0 : i64, scratch_operands = 0 : i64, tpu.core_type = #tpu.core_type<tc>, window_params = [{transform_indices = @transform_0, window_bounds = array<i64: 1, 4, 256>}, {pipeline_mode = #tpu.pipeline_mode<synchronous>, transform_indices = @transform_1, window_bounds = array<i64: 8, 4>}, {pipeline_mode = #tpu.pipeline_mode<synchronous>, transform_indices = @transform_2, window_bounds = array<i64: 8, 1>}, {transform_indices = @transform_3, window_bounds = array<i64: 1, 8, 256>}]} {
    %c0 = arith.constant 0 : index
    %c0_0 = arith.constant 0 : index
    %0 = vector.load %arg3[%c0, %c0_0] : memref<8x4xf32, #tpu.memory_space<vmem>>, vector<8x4xf32>
    %1 = vector.extract_strided_slice %0 {offsets = [0, 0], sizes = [8, 1], strides = [1, 1]} : vector<8x4xf32> to vector<8x1xf32>
    %2 = vector.extract_strided_slice %0 {offsets = [0, 1], sizes = [8, 1], strides = [1, 1]} : vector<8x4xf32> to vector<8x1xf32>
    %3 = vector.extract_strided_slice %0 {offsets = [0, 2], sizes = [8, 1], strides = [1, 1]} : vector<8x4xf32> to vector<8x1xf32>
    %4 = vector.extract_strided_slice %0 {offsets = [0, 3], sizes = [8, 1], strides = [1, 1]} : vector<8x4xf32> to vector<8x1xf32>
    %c0_1 = arith.constant 0 : index
    %c0_2 = arith.constant 0 : index
    %5 = vector.load %arg4[%c0_1, %c0_2] : memref<8x1xf32, #tpu.memory_space<vmem>>, vector<8x1xf32>
    %6 = vector.shape_cast %5 : vector<8x1xf32> to vector<8x1xf32>
    %7 = vector.broadcast %6 : vector<8x1xf32> to vector<8x256xf32>
    %c0_3 = arith.constant 0 : index
    %c0_4 = arith.constant 0 : index
    %c0_5 = arith.constant 0 : index
    %8 = vector.load %arg2[%c0_3, %c0_4, %c0_5] : memref<1x4x256xf32, #tpu.memory_space<vmem>>, vector<1x4x256xf32>
    %9 = vector.shape_cast %8 : vector<1x4x256xf32> to vector<4x256xf32>
    %10 = vector.extract_strided_slice %9 {offsets = [0, 0], sizes = [1, 256], strides = [1, 1]} : vector<4x256xf32> to vector<1x256xf32>
    %11 = vector.broadcast %1 : vector<8x1xf32> to vector<8x256xf32>
    %12 = vector.broadcast %10 : vector<1x256xf32> to vector<8x256xf32>
    %13 = arith.mulf %11, %12 : vector<8x256xf32>
    %14 = arith.addf %7, %13 : vector<8x256xf32>
    %15 = vector.extract_strided_slice %9 {offsets = [1, 0], sizes = [1, 256], strides = [1, 1]} : vector<4x256xf32> to vector<1x256xf32>
    %16 = vector.broadcast %2 : vector<8x1xf32> to vector<8x256xf32>
    %17 = vector.broadcast %15 : vector<1x256xf32> to vector<8x256xf32>
    %18 = arith.mulf %16, %17 : vector<8x256xf32>
    %19 = arith.addf %14, %18 : vector<8x256xf32>
    %20 = vector.extract_strided_slice %9 {offsets = [2, 0], sizes = [1, 256], strides = [1, 1]} : vector<4x256xf32> to vector<1x256xf32>
    %21 = vector.broadcast %3 : vector<8x1xf32> to vector<8x256xf32>
    %22 = vector.broadcast %20 : vector<1x256xf32> to vector<8x256xf32>
    %23 = arith.mulf %21, %22 : vector<8x256xf32>
    %24 = arith.addf %19, %23 : vector<8x256xf32>
    %25 = vector.extract_strided_slice %9 {offsets = [3, 0], sizes = [1, 256], strides = [1, 1]} : vector<4x256xf32> to vector<1x256xf32>
    %26 = vector.broadcast %4 : vector<8x1xf32> to vector<8x256xf32>
    %27 = vector.broadcast %25 : vector<1x256xf32> to vector<8x256xf32>
    %28 = arith.mulf %26, %27 : vector<8x256xf32>
    %29 = arith.addf %24, %28 : vector<8x256xf32>
    %c0_6 = arith.constant 0 : index
    %c0_7 = arith.constant 0 : index
    %c0_8 = arith.constant 0 : index
    %30 = vector.load %arg5[%c0_6, %c0_7, %c0_8] : memref<1x8x256xf32, #tpu.memory_space<vmem>>, vector<1x8x256xf32>
    %31 = vector.shape_cast %30 : vector<1x8x256xf32> to vector<8x256xf32>
    %32 = vector.shape_cast %29 : vector<8x256xf32> to vector<1x8x256xf32>
    tpu.vector_store %arg5[%c0_6, %c0_7, %c0_8], %32 {strides = array<i32>} : memref<1x8x256xf32, #tpu.memory_space<vmem>>, vector<1x8x256xf32>,
    return
  }
  func.func @transform_0(%arg0: i32, %arg1: i32) -> (i32, i32, i32) {
    %c0_i32 = arith.constant 0 : i32
    %c0_i32_0 = arith.constant 0 : i32
    return %arg0, %c0_i32, %arg1 : i32, i32, i32
  }
  func.func @transform_1(%arg0: i32, %arg1: i32) -> (i32, i32) {
    %c0_i32 = arith.constant 0 : i32
    %c0_i32_0 = arith.constant 0 : i32
    %c0_i32_1 = arith.constant 0 : i32
    return %c0_i32, %c0_i32_0 : i32, i32
  }
  func.func @transform_2(%arg0: i32, %arg1: i32) -> (i32, i32) {
    %c0_i32 = arith.constant 0 : i32
    %c0_i32_0 = arith.constant 0 : i32
    %c0_i32_1 = arith.constant 0 : i32
    return %c0_i32, %c0_i32_0 : i32, i32
  }
  func.func @transform_3(%arg0: i32, %arg1: i32) -> (i32, i32, i32) {
    %c0_i32 = arith.constant 0 : i32
    %c0_i32_0 = arith.constant 0 : i32
    return %arg0, %c0_i32, %arg1 : i32, i32, i32
  }
}

</mosaic_0001>

<bundles_post_ra>
// kernel: tpu_custom_call.1
= control target key start
LH: loop header
LB: loop body
LE: loop exit
PB: predicated region body
PF: predicated region fallthrough
CT: control target
= control target key end

     0   :  { %8 = vsyncpa [#allocation3], 0  ;;  %s714_s0 = inlined_call_operand.vmem [shape: f32[2,4,256], index: 0, kind: input, shape index: {}]   ;;  %s715_s1 = inlined_call_operand.vmem [shape: f32[8,4], index: 1, kind: input, shape index: {}]   ;;  %s716_s2 = inlined_call_operand.vmem [shape: f32[8,1], index: 2, kind: input, shape index: {}]   ;;  %s717_s3 = inlined_call_operand.hbm [shape: f32[2,8,256], index: 3, kind: output, shape index: {}]  }
   0x1   :  { %10 = vsyncpa [#allocation3 + $0x1], 0  ;;  %s592_s12 = smov 0   ;;  %s594_s13 = smov 0  }
   0x2   :  { %s596_s14 = smov 0   ;;  %s598_s15 = smov 0  }
   0x3   :  { %s600_s16 = smov 0   ;;  %s602_s17 = smov 0  }
   0x4 LB: > { %s409_s18 = sadd.s32 4294967295, %s565_s17   ;;  %s410_s19 = sadd.s32 4294967294, %s565_s17   ;;  %s565_s17 = sphi %s602_s17, %s16_s17   ;;  %s561_s16 = sphi %s600_s16, %s724_s16   ;;  %s557_s15 = sphi %s598_s15, %s723_s15   ;;  %s553_s14 = sphi %s596_s14, %s722_s14   ;;  %s549_s13 = sphi %s594_s13, %s721_s13   ;;  %s545_s12 = sphi %s592_s12, %s720_s12  }
   0x5   : > { %s28_s20 = sadd.s32 1, %s561_s16  ;;  %s107_s21 = sadd.s32 1, %s553_s14 }
   0x6   : > { %p30_p0 = scmp.ge.s32.totalorder %s28_s20, 2  ;;  %p117_p1 = scmp.ne.s32.totalorder %s553_s14, %s549_s13 }
   0x7   : > { %p118_p2 = scmp.eq.s32.totalorder %s409_s18, 1  ;;  %p123_p3 = scmp.ne.s32.totalorder %s549_s13, %s545_s12 }
   0x8   : > { %s726_s20 = smov (%p30_p0, %s28_s20), 0  ;;  %p124_p5 = scmp.eq.s32.totalorder %s410_s19, 1 }
   0x9   : > { %p632_p4 = por %p118_p2, %p117_p1  ;;  %s102_s23 = ssub.s32 %s561_s16, %s726_s20 }
   0xa   : > { %p413_p6 = scmp.ge.s32.totalorder %s565_s17, 1  ;;  %p105_p7 = scmp.eq.s32.totalorder %s102_s23, 0 }
   0xb   : > { %p639_p8 = por %p124_p5, %p123_p3  ;;  %p161_p9 = scmp.lt.s32.totalorder %s565_s17, 3 }
   0xc   : > { %s645_s25 = scalar_select %p105_p7, %s553_s14, %s107_s21  }
   0xd   : > { %p162_p10 = pnand %p413_p6, %p161_p9 }
   0xe   : > { %v200_v0 = vld [vmem:[%s715_s1] sm:$0xff] (!%p162_p10)  ;;  %v567_v1 = vmov (!%p162_p10), 0   ;;  %v568_v2 = vmov (!%p162_p10), 1   ;;  %v569_v4 = vmov (!%p162_p10), 2   ;;  %v570_v5 = vmov (!%p162_p10), 3   ;;  %p190_p11 = scmp.lt.s32.totalorder (!%p162_p10), %s557_s15, 1 }
   0xf   : > { %165 = sbr.rel (%p162_p10) target bundleno = 171 (0xab), region = 32  ;;  %483 = vset.pattern.permute.xlu0 (!%p162_p10), %v567_v1  ;;  %484 = vset.pattern.permute.xlu1 (!%p162_p10), %v568_v2  ;;  %v201_v3 = vld [vmem:[%s716_s2] sm:$0xff] (!%p162_p10)  ;;  %v214_v6 = vlaneseq (!%p162_p10)  ;;  %s186_s8 = sand.u32 (!%p162_p10), 1, %s549_s13  }
  0x10   : > { %210 = vperm.xlu0 (!%p162_p10), %483, %v200_v0   ;;  %237 = vperm.xlu1 (!%p162_p10), %484, %v200_v0   ;;  %s414_s9 = sshll.u32 (!%p162_p10), %s186_s8, 4  ;;  %s423_s10 = sshll.u32 (!%p162_p10), %s557_s15, 8 }
  0x11   : > { %v215_v7 = vshrl.u32 (!%p162_p10), %v214_v6, 7  ;;  %s188_s11 = scalar_lea.vmem (!%p162_p10), [#allocation2], %s414_s9  ;;  %s665_s23 = scalar_lea.hbm (!%p162_p10), %s717_s3, %s423_s10 }
  0x12   : > { %s333_s18 = sshll.u32 (!%p162_p10), %s188_s11, 4  ;;  %s571_s27 = smov (!%p162_p10), [#allocation2]   ;;  %s667_s18 = int_to_ptr.vmem [resolvable:$true] %s333_s18 }
  0x13   : > { %v216_v8 = vsub.s32 (!%p162_p10), 0, %v215_v7  ;;  %v220_v9 = vsub.s32 (!%p162_p10), 4, %v215_v7  ;;  %v242_v11 = vsub.s32 (!%p162_p10), 1, %v215_v7  ;;  %v246_v12 = vsub.s32 (!%p162_p10), 5, %v215_v7  ;;  %s487_s26 = scalar_lea.vmem (!%p162_p10), %s667_s18, 256  ;;  %s491_s28 = sshll.u32 (!%p162_p10), %s571_s27, 4  ;;  %s492_s28 = int_to_ptr.vmem [resolvable:$false] %s491_s28 }
  0x14   : > { %204 = vperm.xlu0 (!%p162_p10), %483, %v201_v3   ;;  %485 = vset.pattern.permute.xlu1 (!%p162_p10), %v569_v4  ;;  %v268_v13 = vsub.s32 (!%p162_p10), 2, %v215_v7  ;;  %v272_v14 = vsub.s32 (!%p162_p10), 6, %v215_v7  ;;  %v294_v21 = vsub.s32 (!%p162_p10), 3, %v215_v7  ;;  %v298_v22 = vsub.s32 (!%p162_p10), 7, %v215_v7  ;;  %p488_p12 = scmp.ne.s32.totalorder (!%p162_p10), %s667_s18, %s487_s26  ;;  %s493_s29 = scalar_lea.vmem (!%p162_p10), %s492_s28, 512 }
  0x15   : > { %263 = vperm.xlu1 (!%p162_p10), %485, %v200_v0   ;;  %p494_p1 = scmp.lt.s32.totalorder (!%p162_p10), %s667_s18, %s492_s28  ;;  %p495_p2 = scmp.lt.s32.totalorder (!%p162_p10), %s493_s29, %s487_s26 }
  0x16   : > { %s191_s30 = scalar_select %p190_p11, %s557_s15, 1 }
  0x17   : > { %s317_s15 = scalar_lea.sflag [#allocation3], %s186_s8  ;;  %p489_p13 = pnand %p488_p12, %p632_p4 }
  0x18   : > { %486 = vset.pattern.permute.xlu0 %v570_v5  ;;  %s422_s4 = sshll.u32 %s191_s30, 3  ;;  %p496_p3 = por %p495_p2, %p494_p1 }
  0x19   : > { %289 = vperm.xlu0 %486, %v200_v0   ;;  %s197_s7 = scalar_lea.vmem %s714_s0, %s422_s4  ;;  %p490_p0 = pneg %p489_p13 }
  0x1a   : > { %v207_v10 = vld [vmem:[%s197_s7] sm:$0xff] }
  0x1b   : > { %v217_v15 = vrot.slane %v207_v10, %v216_v8  ;;  %v221_v16 = vrot.slane %v207_v10, %v220_v9  ;;  %v243_v17 = vrot.slane %v207_v10, %v242_v11  ;;  %v247_v18 = vrot.slane %v207_v10, %v246_v12  ;;  %p497_p5 = pnand %p496_p3, %p490_p0 }
  0x1c   : > { %v269_v19 = vrot.slane %v207_v10, %v268_v13  ;;  %v273_v20 = vrot.slane %v207_v10, %v272_v14  ;;  %v295_v31 = vrot.slane %v207_v10, %v294_v21  ;;  %v299_v32 = vrot.slane %v207_v10, %v298_v22 }
  0x1d   : > { %v227_v23 = vrot.slane %v217_v15, %v216_v8  ;;  %v231_v24 = vrot.slane %v221_v16, %v216_v8  ;;  %v253_v27 = vrot.slane %v243_v17, %v242_v11  ;;  %v257_v28 = vrot.slane %v247_v18, %v242_v11 }
  0x1e   : > { %v279_v29 = vrot.slane %v269_v19, %v268_v13  ;;  %v283_v30 = vrot.slane %v273_v20, %v268_v13  ;;  %v305_v43 = vrot.slane %v295_v31, %v294_v21  ;;  %v309_v44 = vrot.slane %v299_v32, %v294_v21 }
  0x8f   : > { %v211_v25 = vpop.permute.xlu0 %210  ;;  %v238_v26 = vpop.permute.xlu1 %237 }
  0x90   : > { %v232_v33 = vmul.f32 %v227_v23, %v211_v25  ;;  %v233_v34 = vmul.f32 %v231_v24, %v211_v25  ;;  %v258_v36 = vmul.f32 %v253_v27, %v238_v26  ;;  %v259_v37 = vmul.f32 %v257_v28, %v238_v26 }
  0x93   : > { %v205_v35 = vpop.permute.xlu0 %204 }
  0x94   : > { %v234_v38 = vadd.f32 %v232_v33, %v205_v35  ;;  %v235_v39 = vadd.f32 %v233_v34, %v205_v35  ;;  %v264_v40 = vpop.permute.xlu1 %263 }
  0x95   : > { %v284_v41 = vmul.f32 %v279_v29, %v264_v40  ;;  %v285_v42 = vmul.f32 %v283_v30, %v264_v40 }
  0x96   : > { %v260_v45 = vadd.f32 %v258_v36, %v234_v38  ;;  %v261_v46 = vadd.f32 %v259_v37, %v235_v39 }
  0x98   : > { %v286_v47 = vadd.f32 %v284_v41, %v260_v45  ;;  %v287_v48 = vadd.f32 %v285_v42, %v261_v46  ;;  %v290_v49 = vpop.permute.xlu0 %289 }
  0x99   : > { %v310_v50 = vmul.f32 %v305_v43, %v290_v49  ;;  %v311_v51 = vmul.f32 %v309_v44, %v290_v49 }
  0x9b   : > { %v312_v52 = vadd.f32 %v310_v50, %v286_v47  ;;  %v313_v53 = vadd.f32 %v311_v51, %v287_v48 }
  0x9d   : > { %314 = vst [vmem:[%s188_s11] sm:$0xff] %v312_v52  ;;  %315 = vst [vmem:[%s188_s11 + $0x8] sm:$0xff] %v313_v53 }
  0x9e   : > { %500 = shalt.err (!%p497_p5)
}
  0x9f   : > { %s501_s30 = scalar_lea.hbm %s665_s23, 256  ;;  %s505_s6 = scalar_lea.hbm %s717_s3, 512 }
  0xa0   : > { %p502_p6 = scmp.ne.s32.totalorder %s665_s23, %s501_s30  ;;  %p506_p10 = scmp.lt.u32.totalorder %s665_s23, %s717_s3 }
  0xa1   : > { %p507_p11 = scmp.lt.u32.totalorder %s505_s6, %s501_s30  ;;  %p509_p13 = scmp.lt.u32.totalorder %s501_s30, %s665_s23 }
  0xa2   : > { %p503_p7 = pnand %p502_p6, %p632_p4 }
  0xa3   : > { %p508_p12 = por %p507_p11, %p506_p10 }
  0xa4   : > { %p504_p9 = pneg %p503_p7 }
  0xa5   : > { %p510_p0 = por %p509_p13, %p508_p12 }
  0xa7   : > { %p511_p1 = pnand %p510_p0, %p504_p9 }
  0xa9   : > { %514 = shalt.err (!%p511_p1)
}
  0xaa   : > { %424 = dma.vmem_to_hbm [thread:$0]  (%p632_p4), %s667_s18, 256, %s665_s23, %s317_s15  }
  0xab PF: > { %p430_p2 = scmp.ge.s32.totalorder %s565_s17, 2  ;;  %s345_s9 = sand.u32 1, %s545_s12  }
  0xac   : > { %s346_s10 = scalar_lea.sflag [#allocation3], %s345_s9 }
  0xad   : > { %p427_p3 = pnand %p430_p2, %p639_p8 }
  0xaf   : > { %540 = dma.done.wait (!%p427_p3), %s346_s10, 256  }
  0xb0   : > { %542 = vsyncadd (!%p427_p3), %s346_s10, 4294967040  ;;  %s16_s17 = sadd.s32 1, %s565_s17   ;;  %s720_s12 = smov %s549_s13 }
  0xb1   : > { %p13_p5 = scmp.ge.s32.totalorder %s16_s17, 4   ;;  %s721_s13 = smov %s553_s14 }
  0xb2   : > { %s722_s14 = smov %s645_s25  ;;  %s723_s15 = smov %s561_s16 }
  0xb3   : > { %s724_s16 = smov %s726_s20  ;;  %15 = sbr.rel (!%p13_p5) target bundleno = 4 (0x4), region = 67 }
  0xba   :  { %351 = vsyncpa [#allocation3], 1 }
  0xbb   :  { %353 = vsyncpa [#allocation3 + $0x1], 1 }

</bundles_post_ra>
